<compile_context>
chip_gen: v6e
topology: v6e:2x2x1
jax: 0.10.0
libtpu: 0.0.40
codegen_flags: <defaults>
</compile_context>

<pallas_src>
import functools

import jax
import jax.numpy as jnp
from jax.experimental import pallas as pl
from jax.experimental.pallas import tpu as pltpu


def _fuse_kernel(x_ref, w1_ref, b1_ref, w2_ref, b2_ref, w3_ref, b3_ref, o_ref):
    # x_ref:  (1, Cin, T)    block of x viewed as (N_eff, Cin, HW_eff)
    # wK_ref: (CoutK, CinK)  PyTorch-layout weights, VMEM-resident, pre-cast
    # bK_ref: (CoutK, 1)     f32
    # o_ref:  (1, Cout, T)   block of the interior output
    def stage(h, w_ref, b_ref):
        acc = jnp.dot(w_ref[...], h.astype(w_ref.dtype),
                      preferred_element_type=jnp.float32)
        return jnp.maximum(acc + b_ref[...], 0.0)         # bias + ReLU in f32

    h = x_ref[0]                                          # (Cin, T), pre-cast dtype
    h = stage(h, w1_ref, b1_ref)                          # (Cin, T) f32
    h = stage(h, w2_ref, b2_ref)                          # (Cin, T) f32
    h = stage(h, w3_ref, b3_ref)                          # (Cout, T) f32
    o_ref[0] = h.astype(o_ref.dtype)


def _pick_tile(HW_eff, N_eff, Cin, Cout, x_itemsize, t_hw):
    """Lane-aligned spatial tile sized against a conservative VMEM budget."""
    if HW_eff <= 128:
        return HW_eff

    def tile_bytes(T):
        return (2 * Cin * T * x_itemsize        # x block, double-buffered
                + 2 * Cout * T * 4              # out block, double-buffered
                + 2 * Cin * T * 4)              # f32 stage intermediates

    # Weights are resident (constant index_map) but still double-buffered.
    weight_bytes = 2 * (2 * Cin * Cin + Cout * Cin) * x_itemsize
    budget = min(28 << 20, max(6 << 20, (44 << 20) - weight_bytes))

    T = min(HW_eff, t_hw)
    if T < HW_eff:
        T = max(128, (T // 128) * 128)
    while T > 128 and tile_bytes(T) > budget:
        T = max(128, ((T // 2) // 128) * 128)

    # v7x has 2 TensorCores: make sure the (N_eff, tiles) grid has >=2
    # "parallel" steps whenever the problem is big enough to split.
    if N_eff * (-(-HW_eff // T)) < 2 and HW_eff >= 256:
        T = min(T, ((HW_eff + 1) // 2 + 127) // 128 * 128)
    return T


@functools.partial(jax.jit, static_argnames=("t_hw", "use_bf16"))
def fuse_forward(x_nchw, params, *, t_hw=2048, use_bf16=True):
    """params: list of (w, b), PyTorch layout: w (Cout, Cin), b (Cout,)."""
    (w1, b1), (w2, b2), (w3, b3) = params
    N, Cin, H, W = x_nchw.shape
    Cout = w3.shape[0]
    HW = H * W
    out_dtype = x_nchw.dtype

    # MXU input dtype: bf16 by default (v6e/v7x); f32 path available.
    store_dtype = jnp.bfloat16 if use_bf16 else jnp.float32

    # Lane density: for small spatial maps fold the batch into the lane axis
    # so stores are unmasked full-lane vst; the transpose is cheap there.
    fold_batch = (HW < 128) and (N > 1)
    if fold_batch:
        x_view = x_nchw.transpose(1, 0, 2, 3).reshape(1, Cin, N * HW)
        N_eff, HW_eff = 1, N * HW
    else:
        x_view = x_nchw.reshape(N, Cin, HW)       # free reshape, no transpose
        N_eff, HW_eff = N, HW

    # Cast ONCE outside the kernel (halves x DMA for bf16, no per-step casts).
    x_view = x_view.astype(store_dtype)
    w1c, w2c, w3c = (w.astype(store_dtype) for w in (w1, w2, w3))
    b1c, b2c, b3c = (b.astype(jnp.float32).reshape(-1, 1) for b in (b1, b2, b3))

    x_itemsize = jnp.dtype(store_dtype).itemsize
    out_itemsize = jnp.dtype(out_dtype).itemsize
    T = _pick_tile(HW_eff, N_eff, Cin, Cout, x_itemsize, t_hw)
    grid = (N_eff, pl.cdiv(HW_eff, T))

    weight_bytes = 2 * (2 * Cin * Cin + Cout * Cin) * x_itemsize
    tile_working = 2 * Cin * T * x_itemsize + 2 * Cout * T * 4 + 2 * Cin * T * 4
    vmem_limit = int(min(56 << 20,
                         max(16 << 20, 2 * (weight_bytes + tile_working))))

    flops = 2 * N * HW * (2 * Cin * Cin + Cin * Cout)
    bytes_accessed = (x_view.size * x_itemsize
                      + N_eff * Cout * HW_eff * out_itemsize
                      + (2 * Cin * Cin + Cout * Cin) * x_itemsize
                      + 4 * (2 * Cin + Cout))

    interior = pl.pallas_call(
        _fuse_kernel,
        out_shape=jax.ShapeDtypeStruct((N_eff, Cout, HW_eff), out_dtype),
        grid_spec=pltpu.PrefetchScalarGridSpec(
            num_scalar_prefetch=0,
            grid=grid,
            in_specs=[
                pl.BlockSpec((1, Cin, T), lambda n, t: (n, 0, t)),
                pl.BlockSpec((Cin, Cin), lambda n, t: (0, 0)),
                pl.BlockSpec((Cin, 1), lambda n, t: (0, 0)),
                pl.BlockSpec((Cin, Cin), lambda n, t: (0, 0)),
                pl.BlockSpec((Cin, 1), lambda n, t: (0, 0)),
                pl.BlockSpec((Cout, Cin), lambda n, t: (0, 0)),
                pl.BlockSpec((Cout, 1), lambda n, t: (0, 0)),
            ],
            out_specs=pl.BlockSpec((1, Cout, T), lambda n, t: (n, 0, t)),
        ),
        compiler_params=pltpu.CompilerParams(
            dimension_semantics=("parallel", "parallel"),
            vmem_limit_bytes=vmem_limit),
        cost_estimate=pl.CostEstimate(
            flops=flops, transcendentals=0, bytes_accessed=bytes_accessed),
    )(x_view, w1c, b1c, w2c, b2c, w3c, b3c)

    if fold_batch:
        interior = interior[0].reshape(Cout, N, H, W).transpose(1, 0, 2, 3)
    else:
        interior = interior.reshape(N, Cout, H, W)
    interior = interior.astype(out_dtype)

    # Border rings of the final (H+6, W+6) output are per-channel constants:
    #   r0 = relu(b3); r1 = relu(w3 relu(b2) + b3); r2 = relu(w3 relu(w2 relu(b1)+b2)+b3)
    relu = lambda v: jnp.maximum(v, 0.0)
    w2f, w3f = w2.astype(jnp.float32), w3.astype(jnp.float32)
    b1f, b2f, b3f = (b.astype(jnp.float32) for b in (b1, b2, b3))
    r0 = relu(b3f)
    r1 = relu(w3f @ relu(b2f) + b3f)
    r2 = relu(w3f @ relu(w2f @ relu(b1f) + b2f) + b3f)
    ring_vals = jnp.stack([r0, r1, r2], axis=0).astype(out_dtype)     # (3, Cout)

    Hp, Wp = H + 6, W + 6
    dh = jnp.minimum(jnp.arange(Hp), Hp - 1 - jnp.arange(Hp))
    dw = jnp.minimum(jnp.arange(Wp), Wp - 1 - jnp.arange(Wp))
    ring_idx = jnp.minimum(jnp.minimum(dh[:, None], dw[None, :]), 2)  # (Hp, Wp)
    border = jnp.moveaxis(ring_vals[ring_idx], -1, 0)                 # (Cout, Hp, Wp)

    out = jnp.broadcast_to(border[None], (N, Cout, Hp, Wp))
    out = out.at[:, :, 3:Hp - 3, 3:Wp - 3].set(interior)
    return out


def fuse_reference(x_nchw, params):
    """Pure-JAX reference mirroring the PyTorch semantics exactly."""
    x = x_nchw
    for w, b in params:                                   # w: (Cout, Cin)
        x = jnp.pad(x, ((0, 0), (0, 0), (1, 1), (1, 1)))
        x = jnp.maximum(jnp.einsum("nchw,dc->ndhw", x, w)
                        + b[None, :, None, None], 0.0)
    return x


def init_fuse_params(key, in_channels, out_channels, dtype=jnp.float32):
    """Deterministic synthetic params in PyTorch layout: w (Cout, Cin), b (Cout,)."""
    chans = [(in_channels, in_channels),
             (in_channels, in_channels),
             (in_channels, out_channels)]
    params = []
    for cin, cout in chans:
        key, kw, kb = jax.random.split(key, 3)
        scale = 1.0 / jnp.sqrt(jnp.asarray(cin, dtype))
        w = (jax.random.normal(kw, (cout, cin), dtype) * scale).astype(dtype)
        b = (jax.random.normal(kb, (cout,), dtype) * 0.1).astype(dtype)
        params.append((w, b))
    return params


if __name__ == "__main__":
    # Small shapes consistent with the module: channels shrunk 1280 -> 128
    # (lane-aligned), out_channels=2 as in the default.
    N, CIN, COUT, H, W = 2, 128, 2, 8, 8
    key = jax.random.PRNGKey(0)
    key, kx = jax.random.split(key)
    x = jax.random.normal(kx, (N, CIN, H, W), jnp.float32)
    params = init_fuse_params(key, CIN, COUT)

    ref = fuse_reference(x, params)

    # Default path: bf16 MXU inputs, f32 accumulate/bias/ReLU.
    out_bf16 = jax.block_until_ready(fuse_forward(x, params))
    assert out_bf16.shape == (N, COUT, H + 6, W + 6), out_bf16.shape
    assert out_bf16.dtype == x.dtype
    assert jnp.allclose(out_bf16, ref, atol=1e-1, rtol=1e-1), "bf16 mismatch vs reference"

    # Full-f32 path, tight tolerance.
    out_f32 = jax.block_until_ready(fuse_forward(x, params, use_bf16=False))
    assert out_f32.shape == (N, COUT, H + 6, W + 6), out_f32.shape
    assert jnp.allclose(out_f32, ref, atol=1e-4, rtol=1e-4), "f32 mismatch vs reference"

    print("KERNEL_OK")
</pallas_src>

<mosaic_0001>
module attributes {stable_mosaic.version = 11 : i64} {
  func.func @_fuse_kernel(%arg0: i32, %arg1: i32, %arg2: memref<1x128x128xbf16, #tpu.memory_space<vmem>>, %arg3: memref<128x128xbf16, #tpu.memory_space<vmem>>, %arg4: memref<128x1xf32, #tpu.memory_space<vmem>>, %arg5: memref<128x128xbf16, #tpu.memory_space<vmem>>, %arg6: memref<128x1xf32, #tpu.memory_space<vmem>>, %arg7: memref<2x128xbf16, #tpu.memory_space<vmem>>, %arg8: memref<2x1xf32, #tpu.memory_space<vmem>>, %arg9: memref<1x2x128xf32, #tpu.memory_space<vmem>>) attributes {dimension_semantics = [#tpu.dimension_semantics<parallel>, #tpu.dimension_semantics<parallel>], iteration_bounds = array<i64: 1, 1>, scalar_prefetch = 0 : i64, scratch_operands = 0 : i64, tpu.core_type = #tpu.core_type<tc>, window_params = [{transform_indices = @transform_0, window_bounds = array<i64: 1, 128, 128>}, {pipeline_mode = #tpu.pipeline_mode<synchronous>, transform_indices = @transform_1, window_bounds = array<i64: 128, 128>}, {pipeline_mode = #tpu.pipeline_mode<synchronous>, transform_indices = @transform_2, window_bounds = array<i64: 128, 1>}, {pipeline_mode = #tpu.pipeline_mode<synchronous>, transform_indices = @transform_3, window_bounds = array<i64: 128, 128>}, {pipeline_mode = #tpu.pipeline_mode<synchronous>, transform_indices = @transform_4, window_bounds = array<i64: 128, 1>}, {pipeline_mode = #tpu.pipeline_mode<synchronous>, transform_indices = @transform_5, window_bounds = array<i64: 2, 128>}, {pipeline_mode = #tpu.pipeline_mode<synchronous>, transform_indices = @transform_6, window_bounds = array<i64: 2, 1>}, {transform_indices = @transform_7, window_bounds = array<i64: 1, 2, 128>}]} {
    %c0 = arith.constant 0 : index
    %c0_0 = arith.constant 0 : index
    %c0_1 = arith.constant 0 : index
    %0 = vector.load %arg2[%c0, %c0_0, %c0_1] : memref<1x128x128xbf16, #tpu.memory_space<vmem>>, vector<1x128x128xbf16>
    %1 = vector.shape_cast %0 : vector<1x128x128xbf16> to vector<128x128xbf16>
    %c0_2 = arith.constant 0 : index
    %c0_3 = arith.constant 0 : index
    %2 = vector.load %arg3[%c0_2, %c0_3] : memref<128x128xbf16, #tpu.memory_space<vmem>>, vector<128x128xbf16>
    %cst = arith.constant dense<0.000000e+00> : vector<128x128xf32>
    %3 = tpu.matmul %2, %1, %cst {dimension_numbers = #tpu.dot_dimension_numbers<[1], [0], [0], [1], [0, 0, 1, 1], [], []>} : vector<128x128xbf16>, vector<128x128xbf16>, vector<128x128xf32> -> vector<128x128xf32>
    %c0_4 = arith.constant 0 : index
    %c0_5 = arith.constant 0 : index
    %4 = vector.load %arg4[%c0_4, %c0_5] : memref<128x1xf32, #tpu.memory_space<vmem>>, vector<128x1xf32>
    %5 = vector.broadcast %4 : vector<128x1xf32> to vector<128x128xf32>
    %6 = arith.addf %3, %5 : vector<128x128xf32>
    %cst_6 = arith.constant 0.000000e+00 : f32
    %7 = vector.broadcast %cst_6 : f32 to vector<128x128xf32>
    %8 = arith.maximumf %6, %7 : vector<128x128xf32>
    %c0_7 = arith.constant 0 : index
    %c0_8 = arith.constant 0 : index
    %9 = vector.load %arg5[%c0_7, %c0_8] : memref<128x128xbf16, #tpu.memory_space<vmem>>, vector<128x128xbf16>
    %10 = arith.truncf %8 : vector<128x128xf32> to vector<128x128xbf16>
    %cst_9 = arith.constant dense<0.000000e+00> : vector<128x128xf32>
    %11 = tpu.matmul %9, %10, %cst_9 {dimension_numbers = #tpu.dot_dimension_numbers<[1], [0], [0], [1], [0, 0, 1, 1], [], []>} : vector<128x128xbf16>, vector<128x128xbf16>, vector<128x128xf32> -> vector<128x128xf32>
    %c0_10 = arith.constant 0 : index
    %c0_11 = arith.constant 0 : index
    %12 = vector.load %arg6[%c0_10, %c0_11] : memref<128x1xf32, #tpu.memory_space<vmem>>, vector<128x1xf32>
    %13 = vector.broadcast %12 : vector<128x1xf32> to vector<128x128xf32>
    %14 = arith.addf %11, %13 : vector<128x128xf32>
    %cst_12 = arith.constant 0.000000e+00 : f32
    %15 = vector.broadcast %cst_12 : f32 to vector<128x128xf32>
    %16 = arith.maximumf %14, %15 : vector<128x128xf32>
    %c0_13 = arith.constant 0 : index
    %c0_14 = arith.constant 0 : index
    %17 = vector.load %arg7[%c0_13, %c0_14] : memref<2x128xbf16, #tpu.memory_space<vmem>>, vector<2x128xbf16>
    %18 = arith.truncf %16 : vector<128x128xf32> to vector<128x128xbf16>
    %cst_15 = arith.constant dense<0.000000e+00> : vector<2x128xf32>
    %19 = tpu.matmul %17, %18, %cst_15 {dimension_numbers = #tpu.dot_dimension_numbers<[1], [0], [0], [1], [0, 0, 1, 1], [], []>} : vector<2x128xbf16>, vector<128x128xbf16>, vector<2x128xf32> -> vector<2x128xf32>
    %c0_16 = arith.constant 0 : index
    %c0_17 = arith.constant 0 : index
    %20 = vector.load %arg8[%c0_16, %c0_17] : memref<2x1xf32, #tpu.memory_space<vmem>>, vector<2x1xf32>
    %21 = vector.broadcast %20 : vector<2x1xf32> to vector<2x128xf32>
    %22 = arith.addf %19, %21 : vector<2x128xf32>
    %cst_18 = arith.constant 0.000000e+00 : f32
    %23 = vector.broadcast %cst_18 : f32 to vector<2x128xf32>
    %24 = arith.maximumf %22, %23 : vector<2x128xf32>
    %c0_19 = arith.constant 0 : index
    %c0_20 = arith.constant 0 : index
    %c0_21 = arith.constant 0 : index
    %25 = vector.load %arg9[%c0_19, %c0_20, %c0_21] : memref<1x2x128xf32, #tpu.memory_space<vmem>>, vector<1x2x128xf32>
    %26 = vector.shape_cast %25 : vector<1x2x128xf32> to vector<2x128xf32>
    %27 = vector.shape_cast %24 : vector<2x128xf32> to vector<1x2x128xf32>
    tpu.vector_store %arg9[%c0_19, %c0_20, %c0_21], %27 {strides = array<i32>} : memref<1x2x128xf32, #tpu.memory_space<vmem>>, vector<1x2x128xf32>,
    return
  }
  func.func @transform_0(%arg0: i32, %arg1: i32) -> (i32, i32, i32) {
    %c0_i32 = arith.constant 0 : i32
    %c0_i32_0 = arith.constant 0 : i32
    return %arg0, %c0_i32, %arg1 : i32, i32, i32
  }
  func.func @transform_1(%arg0: i32, %arg1: i32) -> (i32, i32) {
    %c0_i32 = arith.constant 0 : i32
    %c0_i32_0 = arith.constant 0 : i32
    %c0_i32_1 = arith.constant 0 : i32
    return %c0_i32, %c0_i32_0 : i32, i32
  }
  func.func @transform_2(%arg0: i32, %arg1: i32) -> (i32, i32) {
    %c0_i32 = arith.constant 0 : i32
    %c0_i32_0 = arith.constant 0 : i32
    %c0_i32_1 = arith.constant 0 : i32
    return %c0_i32, %c0_i32_0 : i32, i32
  }
  func.func @transform_3(%arg0: i32, %arg1: i32) -> (i32, i32) {
    %c0_i32 = arith.constant 0 : i32
    %c0_i32_0 = arith.constant 0 : i32
    %c0_i32_1 = arith.constant 0 : i32
    return %c0_i32, %c0_i32_0 : i32, i32
  }
  func.func @transform_4(%arg0: i32, %arg1: i32) -> (i32, i32) {
    %c0_i32 = arith.constant 0 : i32
    %c0_i32_0 = arith.constant 0 : i32
    %c0_i32_1 = arith.constant 0 : i32
    return %c0_i32, %c0_i32_0 : i32, i32
  }
  func.func @transform_5(%arg0: i32, %arg1: i32) -> (i32, i32) {
    %c0_i32 = arith.constant 0 : i32
    %c0_i32_0 = arith.constant 0 : i32
    %c0_i32_1 = arith.constant 0 : i32
    return %c0_i32, %c0_i32_0 : i32, i32
  }
  func.func @transform_6(%arg0: i32, %arg1: i32) -> (i32, i32) {
    %c0_i32 = arith.constant 0 : i32
    %c0_i32_0 = arith.constant 0 : i32
    %c0_i32_1 = arith.constant 0 : i32
    return %c0_i32, %c0_i32_0 : i32, i32
  }
  func.func @transform_7(%arg0: i32, %arg1: i32) -> (i32, i32, i32) {
    %c0_i32 = arith.constant 0 : i32
    %c0_i32_0 = arith.constant 0 : i32
    return %arg0, %c0_i32, %arg1 : i32, i32, i32
  }
}

</mosaic_0001>

<bundles_post_ra>
// kernel: squeeze.1
= control target key start
LH: loop header
LB: loop body
LE: loop exit
PB: predicated region body
PF: predicated region fallthrough
CT: control target
= control target key end

     0   :  { %s131_s8 = smov 104   ;;  %s132_s9 = smov 112   ;;  %vm8_vm0 = vcmask 64512   ;;  %s222_s0 = inlined_call_operand.vmem [shape: f32[1,2,128], index: 0, kind: input, shape index: {}]   ;;  %s223_s1 = inlined_call_operand.vmem [shape: f32[2,2,8,8], index: 1, kind: output, shape index: {}]  }
   0x1   :  { %v5_v0 = vld [vmem:[%s222_s0] sm:$0x3]  ;;  %s130_s0 = smov 120   ;;  %s133_s10 = smov 96  }
   0x2   :  { %6 = vst [vmem:[#allocation0] sm:$0x3] %v5_v0  ;;  %s134_s11 = smov 88   ;;  %s135_s12 = smov 80  }
   0x3   :  { %s136_s13 = smov 72   ;;  %s137_s14 = smov 64  }
   0x4   :  { %s138_s17 = smov 56   ;;  %s139_s18 = smov 48  }
   0x5   :  { %s140_s19 = smov 40   ;;  %s141_s20 = smov 32  }
   0x6   :  { %s142_s21 = smov 24   ;;  %s143_s22 = smov 16  }
   0x7   :  { %s144_s23 = smov 8  }
   0x9   :  { %v10_v1 = vld [vmem:[#allocation0] sm:$0x3]  }
   0xa   :  { %v22_v2 = vld [vmem:[#allocation0] sm:$0x3]   ;;  %11 = vrot.lane.b32.xlu0 %v10_v1, %s130_s0 }
   0xb   :  { %23 = vrot.lane.b32.xlu1 %v22_v2, %s131_s8  ;;  %v16_v3 = vld [vmem:[#allocation0] sm:$0x3]  }
   0xc   :  { %v28_v4 = vld [vmem:[#allocation0] sm:$0x3]  }
   0xd   :  { %v34_v5 = vld [vmem:[#allocation0] sm:$0x3]  }
   0xe   :  { %17 = vrot.lane.b32.xlu0 %v16_v3, %s132_s9  ;;  %v40_v6 = vld [vmem:[#allocation0] sm:$0x3]  }
   0xf   :  { %29 = vrot.lane.b32.xlu1 %v28_v4, %s133_s10  ;;  %v46_v7 = vld [vmem:[#allocation0] sm:$0x3]  }
  0x10   :  { %v52_v8 = vld [vmem:[#allocation0] sm:$0x3]  }
  0x11   :  { %v58_v9 = vld [vmem:[#allocation0] sm:$0x3]  }
  0x12   :  { %35 = vrot.lane.b32.xlu0 %v34_v5, %s134_s11  ;;  %v64_v10 = vld [vmem:[#allocation0] sm:$0x3]  }
  0x13   :  { %41 = vrot.lane.b32.xlu1 %v40_v6, %s135_s12  ;;  %v7_v11 = vld [vmem:[#allocation0] sm:$0x3]  }
  0x14   :  { %9 = vst.msk [vmem:[%s223_s1] ss:$16 sm:$0x3] %vm8_vm0, %v7_v11   ;;  %v70_v12 = vld [vmem:[#allocation0] sm:$0x3]  }
  0x15   :  { %v76_v13 = vld [vmem:[#allocation0] sm:$0x3]  }
  0x16   :  { %47 = vrot.lane.b32.xlu0 %v46_v7, %s136_s13  ;;  %v82_v14 = vld [vmem:[#allocation0] sm:$0x3]  }
  0x17   :  { %53 = vrot.lane.b32.xlu1 %v52_v8, %s137_s14  ;;  %v88_v15 = vld [vmem:[#allocation0] sm:$0x3]  }
  0x18   :  { %v94_v16 = vld [vmem:[#allocation0] sm:$0x3]  }
  0x1a   :  { %59 = vrot.lane.b32.xlu0 %v58_v9, %s138_s17 }
  0x1b   :  { %65 = vrot.lane.b32.xlu1 %v64_v10, %s139_s18 }
  0x1e   :  { %71 = vrot.lane.b32.xlu0 %v70_v12, %s140_s19 }
  0x1f   :  { %77 = vrot.lane.b32.xlu1 %v76_v13, %s141_s20 }
  0x22   :  { %83 = vrot.lane.b32.xlu0 %v82_v14, %s142_s21 }
  0x23   :  { %89 = vrot.lane.b32.xlu1 %v88_v15, %s143_s22 }
  0x26   :  { %95 = vrot.lane.b32.xlu0 %v94_v16, %s144_s23 }
  0x7c   :  { %v12_v17 = vpop.permute.xlu0 %11  }
  0x7d   :  { %v24_v18 = vpop.permute.xlu1 %23   ;;  %100 = vst.msk [vmem:[%s223_s1 + $0x1] ss:$16 sm:$0x3] %vm8_vm0, %v12_v17  }
  0x7e   :  { %102 = vst.msk [vmem:[%s223_s1 + $0x3] ss:$16 sm:$0x3] %vm8_vm0, %v24_v18  }
  0x80   :  { %v18_v19 = vpop.permute.xlu0 %17  }
  0x81   :  { %v30_v20 = vpop.permute.xlu1 %29   ;;  %101 = vst.msk [vmem:[%s223_s1 + $0x2] ss:$16 sm:$0x3] %vm8_vm0, %v18_v19  }
  0x82   :  { %103 = vst.msk [vmem:[%s223_s1 + $0x4] ss:$16 sm:$0x3] %vm8_vm0, %v30_v20  }
  0x84   :  { %v36_v21 = vpop.permute.xlu0 %35  }
  0x85   :  { %v42_v22 = vpop.permute.xlu1 %41   ;;  %104 = vst.msk [vmem:[%s223_s1 + $0x5] ss:$16 sm:$0x3] %vm8_vm0, %v36_v21  }
  0x86   :  { %105 = vst.msk [vmem:[%s223_s1 + $0x6] ss:$16 sm:$0x3] %vm8_vm0, %v42_v22  }
  0x88   :  { %v48_v23 = vpop.permute.xlu0 %47  }
  0x89   :  { %v54_v24 = vpop.permute.xlu1 %53   ;;  %106 = vst.msk [vmem:[%s223_s1 + $0x7] ss:$16 sm:$0x3] %vm8_vm0, %v48_v23  }
  0x8a   :  { %107 = vst.msk [vmem:[%s223_s1 + $0x8] ss:$16 sm:$0x3] %vm8_vm0, %v54_v24  }
  0x8c   :  { %v60_v25 = vpop.permute.xlu0 %59  }
  0x8d   :  { %v66_v26 = vpop.permute.xlu1 %65   ;;  %108 = vst.msk [vmem:[%s223_s1 + $0x9] ss:$16 sm:$0x3] %vm8_vm0, %v60_v25  }
  0x8e   :  { %109 = vst.msk [vmem:[%s223_s1 + $0xa] ss:$16 sm:$0x3] %vm8_vm0, %v66_v26  }
  0x90   :  { %v72_v27 = vpop.permute.xlu0 %71  }
  0x91   :  { %v78_v28 = vpop.permute.xlu1 %77   ;;  %110 = vst.msk [vmem:[%s223_s1 + $0xb] ss:$16 sm:$0x3] %vm8_vm0, %v72_v27  }
  0x92   :  { %111 = vst.msk [vmem:[%s223_s1 + $0xc] ss:$16 sm:$0x3] %vm8_vm0, %v78_v28  }
  0x94   :  { %v84_v29 = vpop.permute.xlu0 %83  }
  0x95   :  { %v90_v30 = vpop.permute.xlu1 %89   ;;  %112 = vst.msk [vmem:[%s223_s1 + $0xd] ss:$16 sm:$0x3] %vm8_vm0, %v84_v29  }
  0x96   :  { %113 = vst.msk [vmem:[%s223_s1 + $0xe] ss:$16 sm:$0x3] %vm8_vm0, %v90_v30  }
  0x98   :  { %v96_v31 = vpop.permute.xlu0 %95  }
  0x99   :  { %114 = vst.msk [vmem:[%s223_s1 + $0xf] ss:$16 sm:$0x3] %vm8_vm0, %v96_v31  }

// kernel: fuse_forward.1
= control target key start
LH: loop header
LB: loop body
LE: loop exit
PB: predicated region body
PF: predicated region fallthrough
CT: control target
= control target key end

     0   :  { %v884_v1 = vmov 0   ;;  %vm886_vm0 = vmmov 0   ;;  %s1131_s0 = inlined_call_operand.vmem [shape: bf16[1,128,128], index: 0, kind: input, shape index: {}]   ;;  %s1132_s1 = inlined_call_operand.vmem [shape: bf16[128,128], index: 1, kind: input, shape index: {}]   ;;  %s1133_s2 = inlined_call_operand.vmem [shape: f32[128,1], index: 2, kind: input, shape index: {}]   ;;  %s1134_s4 = inlined_call_operand.vmem [shape: f32[128,1], index: 4, kind: input, shape index: {}]   ;;  %s1135_s6 = inlined_call_operand.vmem [shape: f32[2,1], index: 6, kind: input, shape index: {}]   ;;  %s1136_s3 = inlined_call_operand.vmem [shape: bf16[128,128], index: 3, kind: input, shape index: {}]   ;;  %s1137_s5 = inlined_call_operand.vmem [shape: bf16[2,128], index: 5, kind: input, shape index: {}]   ;;  %s1138_s7 = inlined_call_operand.vmem [shape: f32[1,2,128], index: 7, kind: output, shape index: {}]  }
   0x1   :  { %v860_v0 = vld [vmem:[%s1131_s0 + $0x38] sm:$0xff]   ;;  %858 = vset.pattern.permute.xlu0 %v884_v1  ;;  %859 = vset.pattern.permute.xlu1 %v884_v1  ;;  %v861_v2 = vld [vmem:[%s1131_s0 + $0x30] sm:$0xff]   ;;  %v862_v3 = vld [vmem:[%s1131_s0 + $0x28] sm:$0xff]  }
   0x2   :  { %771 = vmatprep.subr.bf16.mxu0 %v860_v0  ;;  %v863_v4 = vld [vmem:[%s1131_s0 + $0x20] sm:$0xff]   ;;  %v864_v6 = vld [vmem:[%s1131_s0 + $0x18] sm:$0xff]   ;;  %v865_v7 = vld [vmem:[%s1131_s0 + $0x10] sm:$0xff]  }
   0x3   :  { %772 = vmatpush3.bf16.msra.mxu0 %v860_v0  ;;  %v868_v5 = vld [vmem:[%s1132_s1] sm:$0xff]   ;;  %v73_v8 = vld [vmem:[%s1133_s2 + $0x70] sm:$0xff]  ;;  %v74_v10 = vld [vmem:[%s1133_s2 + $0x78] sm:$0xff] }
   0x4   :  { %773 = vmatprep.subr.bf16.mxu0 %v861_v2  ;;  %787 = vmatprep.mubr.bf16.mxu0 %v868_v5  ;;  %v71_v9 = vld [vmem:[%s1133_s2 + $0x60] sm:$0xff]  ;;  %v72_v11 = vld [vmem:[%s1133_s2 + $0x68] sm:$0xff]  ;;  %v69_v13 = vld [vmem:[%s1133_s2 + $0x50] sm:$0xff] }
   0x5   :  { %147 = vperm.xlu0 %858, %v73_v8   ;;  %137 = vperm.xlu1 %859, %v71_v9   ;;  %v866_v12 = vld [vmem:[%s1131_s0 + $0x8] sm:$0xff]   ;;  %v70_v14 = vld [vmem:[%s1133_s2 + $0x58] sm:$0xff]  ;;  %v867_v15 = vld [vmem:[%s1131_s0] sm:$0xff]  }
   0x6   :  { %v67_v16 = vld [vmem:[%s1133_s2 + $0x40] sm:$0xff]  ;;  %v68_v17 = vld [vmem:[%s1133_s2 + $0x48] sm:$0xff]  ;;  %v65_v19 = vld [vmem:[%s1133_s2 + $0x30] sm:$0xff] }
   0x7   :  { %774 = vmatpush3.bf16.msra.mxu0 %v861_v2  ;;  %v869_v18 = vld [vmem:[%s1132_s1 + $0x8] sm:$0xff]   ;;  %v66_v20 = vld [vmem:[%s1133_s2 + $0x38] sm:$0xff]  ;;  %v870_v21 = vld [vmem:[%s1132_s1 + $0x10] sm:$0xff]  }
   0x8   :  { %775 = vmatprep.subr.bf16.mxu0 %v862_v3  ;;  %v63_v22 = vld [vmem:[%s1133_s2 + $0x20] sm:$0xff]  ;;  %v64_v23 = vld [vmem:[%s1133_s2 + $0x28] sm:$0xff]  ;;  %v871_v24 = vld [vmem:[%s1132_s1 + $0x18] sm:$0xff]  }
   0x9   :  { %152 = vperm.xlu0 %858, %v74_v10   ;;  %142 = vperm.xlu1 %859, %v72_v11   ;;  %v61_v25 = vld [vmem:[%s1133_s2 + $0x10] sm:$0xff]  ;;  %v62_v26 = vld [vmem:[%s1133_s2 + $0x18] sm:$0xff]  ;;  %v872_v27 = vld [vmem:[%s1132_s1 + $0x20] sm:$0xff]  }
   0xa   :  { %v59_v28 = vld [vmem:[%s1133_s2] sm:$0xff]  ;;  %v60_v29 = vld [vmem:[%s1133_s2 + $0x8] sm:$0xff]  ;;  %v402_v31 = vld [vmem:[%s1134_s4 + $0x70] sm:$0xff] }
   0xb   :  { %776 = vmatpush3.bf16.msra.mxu0 %v862_v3  ;;  %v873_v30 = vld [vmem:[%s1132_s1 + $0x28] sm:$0xff]   ;;  %v403_v32 = vld [vmem:[%s1134_s4 + $0x78] sm:$0xff]  ;;  %v874_v33 = vld [vmem:[%s1132_s1 + $0x30] sm:$0xff]  }
   0xc   :  { %777 = vmatprep.subr.bf16.mxu0 %v863_v4  ;;  %v400_v34 = vld [vmem:[%s1134_s4 + $0x60] sm:$0xff]  ;;  %v401_v35 = vld [vmem:[%s1134_s4 + $0x68] sm:$0xff]  ;;  %v875_v36 = vld [vmem:[%s1132_s1 + $0x38] sm:$0xff]  }
   0xd   :  { %127 = vperm.xlu0 %858, %v69_v13   ;;  %132 = vperm.xlu1 %859, %v70_v14   ;;  %v398_v37 = vld [vmem:[%s1134_s4 + $0x50] sm:$0xff]  ;;  %v399_v38 = vld [vmem:[%s1134_s4 + $0x58] sm:$0xff]  ;;  %v396_v39 = vld [vmem:[%s1134_s4 + $0x40] sm:$0xff] }
   0xe   :  { %v397_v40 = vld [vmem:[%s1134_s4 + $0x48] sm:$0xff]  ;;  %v394_v41 = vld [vmem:[%s1134_s4 + $0x30] sm:$0xff]  ;;  %v395_v42 = vld [vmem:[%s1134_s4 + $0x38] sm:$0xff] }
   0xf   :  { %778 = vmatpush3.bf16.msra.mxu0 %v863_v4  ;;  %v392_v43 = vld [vmem:[%s1134_s4 + $0x20] sm:$0xff]  ;;  %v393_v44 = vld [vmem:[%s1134_s4 + $0x28] sm:$0xff]  ;;  %v390_v45 = vld [vmem:[%s1134_s4 + $0x10] sm:$0xff] }
  0x10   :  { %779 = vmatprep.subr.bf16.mxu0 %v864_v6  ;;  %v391_v46 = vld [vmem:[%s1134_s4 + $0x18] sm:$0xff]  ;;  %v388_v47 = vld [vmem:[%s1134_s4] sm:$0xff]  ;;  %v389_v48 = vld [vmem:[%s1134_s4 + $0x8] sm:$0xff] }
  0x11   :  { %117 = vperm.xlu0 %858, %v67_v16   ;;  %122 = vperm.xlu1 %859, %v68_v17   ;;  %v654_v49 = vld [vmem:[%s1135_s6] sm:$0x3] }
  0x12   :  { %v876_v50 = vld [vmem:[%s1136_s3] sm:$0xff]  }
  0x13   :  { %780 = vmatpush3.bf16.msra.mxu0 %v864_v6  ;;  %819 = vmatprep.mubr.bf16.mxu1 %v876_v50 }
  0x14   :  { %781 = vmatprep.subr.bf16.mxu0 %v865_v7 }
  0x15   :  { %107 = vperm.xlu0 %858, %v65_v19   ;;  %112 = vperm.xlu1 %859, %v66_v20  }
  0x17   :  { %782 = vmatpush3.bf16.msra.mxu0 %v865_v7 }
  0x18   :  { %783 = vmatprep.subr.bf16.mxu0 %v866_v12 }
  0x19   :  { %97 = vperm.xlu0 %858, %v63_v22   ;;  %102 = vperm.xlu1 %859, %v64_v23  }
  0x1b   :  { %784 = vmatpush3.bf16.msra.mxu0 %v866_v12 }
  0x1c   :  { %785 = vmatprep.subr.bf16.mxu0 %v867_v15 }
  0x1d   :  { %87 = vperm.xlu0 %858, %v61_v25   ;;  %92 = vperm.xlu1 %859, %v62_v26  }
  0x1f   :  { %786 = vmatpush3.bf16.msra.mxu0 %v867_v15 }
  0x21   :  { %77 = vperm.xlu0 %858, %v59_v28   ;;  %82 = vperm.xlu1 %859, %v60_v29  }
  0x22   :  { %788 = vmatmul.mubr.bf16.vlgmr.msra.gmra.mxu0 %v869_v18 }
  0x23   :  { %791 = vmatprep.mubr.bf16.mxu0 %v870_v21 }
  0x25   :  { %476 = vperm.xlu0 %858, %v402_v31   ;;  %481 = vperm.xlu1 %859, %v403_v32  }
  0x29   :  { %466 = vperm.xlu0 %858, %v400_v34   ;;  %471 = vperm.xlu1 %859, %v401_v35  }
  0x2a   :  { %792 = vmatmul.mubr.bf16.gmra.mxu0 %v871_v24 }
  0x2b   :  { %795 = vmatprep.mubr.bf16.mxu0 %v872_v27 }
  0x2d   :  { %456 = vperm.xlu0 %858, %v398_v37   ;;  %461 = vperm.xlu1 %859, %v399_v38  }
  0x31   :  { %446 = vperm.xlu0 %858, %v396_v39   ;;  %451 = vperm.xlu1 %859, %v397_v40  }
  0x32   :  { %796 = vmatmul.mubr.bf16.gmra.mxu0 %v873_v30 }
  0x33   :  { %799 = vmatprep.mubr.bf16.mxu0 %v874_v33 }
  0x35   :  { %436 = vperm.xlu0 %858, %v394_v41   ;;  %441 = vperm.xlu1 %859, %v395_v42  }
  0x39   :  { %426 = vperm.xlu0 %858, %v392_v43   ;;  %431 = vperm.xlu1 %859, %v393_v44  }
  0x3a   :  { %800 = vmatmul.mubr.bf16.gmra.mxu0 %v875_v36 }
  0x3d   :  { %416 = vperm.xlu0 %858, %v390_v45   ;;  %421 = vperm.xlu1 %859, %v391_v46  }
  0x41   :  { %406 = vperm.xlu0 %858, %v388_v47   ;;  %411 = vperm.xlu1 %859, %v389_v48  }
  0x45   :  { %657 = vperm.xlu0 %858, %v654_v49  }
  0x80   :  { %v138_v55 = vpop.permute.xlu1 %137  ;;  %v148_v57 = vpop.permute.xlu0 %147 }
  0x84   :  { %v143_v60 = vpop.permute.xlu1 %142  ;;  %v153_v62 = vpop.permute.xlu0 %152 }
  0x88   :  { %v133_v1 = vpop.permute.xlu1 %132  ;;  %v128_v3 = vpop.permute.xlu0 %127 }
  0x8c   :  { %v123_v6 = vpop.permute.xlu1 %122  ;;  %v118_v9 = vpop.permute.xlu0 %117 }
  0x90   :  { %v113_v18 = vpop.permute.xlu1 %112  ;;  %v108_v23 = vpop.permute.xlu0 %107 }
  0x94   :  { %v103_v29 = vpop.permute.xlu1 %102  ;;  %v98_v33 = vpop.permute.xlu0 %97 }
  0x98   :  { %v93_v39 = vpop.permute.xlu1 %92  ;;  %v88_v42 = vpop.permute.xlu0 %87 }
  0x9c   :  { %v83_v48 = vpop.permute.xlu1 %82 }
  0xe2   :  { %v1077_v51 = vpop.f32.mrf.mxu0 }
  0xe3   :  { %v294_v46 = vadd.f32 %v1077_v51, %v88_v42  ;;  %v877_v51 = vld [vmem:[%s1136_s3 + $0x8] sm:$0xff]  }
  0xe4   :  { %v1079_v52 = vpop.f32.mrf.mxu0 }
  0xe6   :  { %v790_v53 = vpop.f32.mrf.mxu0 }
  0xe7   :  { %v297_v43 = vadd.f32 %v790_v53, %v93_v39 }
  0xe8   :  { %v1081_v54 = vpop.f32.mrf.mxu0 }
  0xe9   :  { %v351_v49 = vmax.f32 %v297_v43, 0.0  ;;  %v289_v50 = vadd.f32 %v1081_v54, %v83_v48  ;;  %v878_v54 = vld [vmem:[%s1136_s3 + $0x10] sm:$0xff]  }
  0xea   :  { %v793_v56 = vpop.f32.mrf.mxu0 }
  0xeb   :  { %v310_v34 = vadd.f32 %v793_v56, %v108_v23  ;;  %v78_v56 = vpop.permute.xlu0 %77  ;;  %v349_v53 = vmax.f32 %v289_v50, 0.0 }
  0xec   :  { %v301_v58 = vpop.f32.mrf.mxu0 }
  0xed   :  { %v354_v40 = vmax.f32 %v310_v34, 0.0  ;;  %v302_v41 = vadd.f32 %v301_v58, %v98_v33  ;;  %v286_v58 = vadd.f32 %v1079_v52, %v78_v56  ;;  %v879_v52 = vld [vmem:[%s1136_s3 + $0x18] sm:$0xff]  }
  0xee   :  { %v794_v59 = vpop.f32.mrf.mxu0 }
  0xef   :  { %v313_v30 = vadd.f32 %v794_v59, %v113_v18  ;;  %v352_v47 = vmax.f32 %v302_v41, 0.0 }
  0xf0   :  { %v304_v61 = vpop.f32.mrf.mxu0 }
  0xf1   :  { %v355_v36 = vmax.f32 %v313_v30, 0.0  ;;  %v305_v37 = vadd.f32 %v304_v61, %v103_v29 }
  0xf2   :  { %v797_v63 = vpop.f32.mrf.mxu0 }
  0xf3   :  { %v326_v19 = vadd.f32 %v797_v63, %v128_v3  ;;  %v383_v44 = vpack.c.bf16 %v355_v36, %v354_v40  ;;  %v353_v45 = vmax.f32 %v305_v37, 0.0  ;;  %v881_v63 = vld [vmem:[%s1136_s3 + $0x28] sm:$0xff]  }
  0xf4   :  { %v317_v0 = vpop.f32.mrf.mxu0 }
  0xf5   :  { %v358_v27 = vmax.f32 %v326_v19, 0.0  ;;  %v318_v28 = vadd.f32 %v317_v0, %v118_v9  ;;  %v882_v0 = vld [vmem:[%s1136_s3 + $0x30] sm:$0xff]  }
  0xf6   :  { %v798_v2 = vpop.f32.mrf.mxu0 }
  0xf7   :  { %v329_v14 = vadd.f32 %v798_v2, %v133_v1  ;;  %v356_v35 = vmax.f32 %v318_v28, 0.0  ;;  %v883_v1 = vld [vmem:[%s1136_s3 + $0x38] sm:$0xff]   ;;  %v885_v2 = vmov 0.0  }
  0xf8   :  { %v320_v4 = vpop.f32.mrf.mxu0  ;;  %835 = vmatprep.subr.bf16.mxu0 %v885_v2  ;;  %851 = vmatprep.mubr.msk.bf16.mxu0 %vm886_vm0, %v885_v2 }
  0xf9   :  { %v359_v24 = vmax.f32 %v329_v14, 0.0  ;;  %v321_v25 = vadd.f32 %v320_v4, %v123_v6 }
  0xfa   :  { %v801_v5 = vpop.f32.mrf.mxu0 }
  0xfb   :  { %v342_v8 = vadd.f32 %v801_v5, %v148_v57  ;;  %v385_v31 = vpack.c.bf16 %v359_v24, %v358_v27  ;;  %v357_v32 = vmax.f32 %v321_v25, 0.0  ;;  %v350_v57 = vmax.f32 %v294_v46, 0.0 }
  0xfc   :  { %v333_v7 = vpop.f32.mrf.mxu0 }
  0xfd   :  { %v334_v11 = vadd.f32 %v333_v7, %v138_v55  ;;  %v362_v15 = vmax.f32 %v342_v8, 0.0  ;;  %v384_v38 = vpack.c.bf16 %v357_v32, %v356_v35  ;;  %v382_v55 = vpack.c.bf16 %v353_v45, %v352_v47  ;;  %v482_v8 = vpop.permute.xlu1 %481 }
  0xfe   :  { %v802_v10 = vpop.f32.mrf.mxu0  ;;  %v381_v59 = vpack.c.bf16 %v351_v49, %v350_v57 }
  0xff   :  { %v345_v12 = vadd.f32 %v802_v10, %v153_v62  ;;  %v360_v20 = vmax.f32 %v334_v11, 0.0  ;;  %v880_v62 = vld [vmem:[%s1136_s3 + $0x20] sm:$0xff]   ;;  %v477_v10 = vpop.permute.xlu0 %476 }
 0x100   :  { %v336_v13 = vpop.f32.mrf.mxu0 }
 0x101   :  { %v363_v16 = vmax.f32 %v345_v12, 0.0  ;;  %v337_v17 = vadd.f32 %v336_v13, %v143_v60  ;;  %v348_v60 = vmax.f32 %v286_v58, 0.0  ;;  %v472_v13 = vpop.permute.xlu1 %471 }
 0x103   :  { %v361_v21 = vmax.f32 %v337_v17, 0.0  ;;  %v387_v22 = vpack.c.bf16 %v363_v16, %v362_v15  ;;  %v380_v61 = vpack.c.bf16 %v349_v53, %v348_v60  ;;  %v467_v15 = vpop.permute.xlu0 %466 }
 0x105   :  { %v386_v26 = vpack.c.bf16 %v361_v21, %v360_v20  ;;  %803 = vmatprep.subr.bf16.mxu1 %v387_v22  ;;  %v462_v18 = vpop.permute.xlu1 %461 }
 0x106   :  { %804 = vmatpush3.bf16.msra.mxu1 %v387_v22 }
 0x107   :  { %805 = vmatprep.subr.bf16.mxu1 %v386_v26  ;;  %v457_v20 = vpop.permute.xlu0 %456 }
 0x109   :  { %v452_v24 = vpop.permute.xlu1 %451 }
 0x10a   :  { %806 = vmatpush3.bf16.msra.mxu1 %v386_v26 }
 0x10b   :  { %807 = vmatprep.subr.bf16.mxu1 %v385_v31  ;;  %v447_v27 = vpop.permute.xlu0 %446 }
 0x10d   :  { %v442_v36 = vpop.permute.xlu1 %441 }
 0x10e   :  { %808 = vmatpush3.bf16.msra.mxu1 %v385_v31 }
 0x10f   :  { %809 = vmatprep.subr.bf16.mxu1 %v384_v38  ;;  %v437_v39 = vpop.permute.xlu0 %436 }
 0x111   :  { %v432_v45 = vpop.permute.xlu1 %431 }
 0x112   :  { %810 = vmatpush3.bf16.msra.mxu1 %v384_v38 }
 0x113   :  { %811 = vmatprep.subr.bf16.mxu1 %v383_v44  ;;  %v427_v49 = vpop.permute.xlu0 %426 }
 0x116   :  { %812 = vmatpush3.bf16.msra.mxu1 %v383_v44 }
 0x117   :  { %813 = vmatprep.subr.bf16.mxu1 %v382_v55 }
 0x11a   :  { %814 = vmatpush3.bf16.msra.mxu1 %v382_v55 }
 0x11b   :  { %815 = vmatprep.subr.bf16.mxu1 %v381_v59 }
 0x11e   :  { %816 = vmatpush3.bf16.msra.mxu1 %v381_v59  ;;  %v422_v59 = vpop.permute.xlu1 %421 }
 0x11f   :  { %817 = vmatprep.subr.bf16.mxu1 %v380_v61 }
 0x122   :  { %818 = vmatpush3.bf16.msra.mxu1 %v380_v61  ;;  %v417_v61 = vpop.permute.xlu0 %416 }
 0x125   :  { %820 = vmatmul.mubr.bf16.vlgmr.msra.gmra.mxu1 %v877_v51 }
 0x126   :  { %823 = vmatprep.mubr.bf16.mxu1 %v878_v54 }
 0x12d   :  { %824 = vmatmul.mubr.bf16.gmra.mxu1 %v879_v52 }
 0x12e   :  { %827 = vmatprep.mubr.bf16.mxu1 %v880_v62 }
 0x135   :  { %828 = vmatmul.mubr.bf16.gmra.mxu1 %v881_v63 }
 0x136   :  { %831 = vmatprep.mubr.bf16.mxu1 %v882_v0  ;;  %v412_v0 = vpop.permute.xlu1 %411 }
 0x13d   :  { %832 = vmatmul.mubr.bf16.gmra.mxu1 %v883_v1 }
 0x1e5   :  { %v1109_v3 = vpop.f32.mrf.mxu1 }
 0x1e6   :  { %v575_v62 = vadd.f32 %v1109_v3, %v417_v61 }
 0x1e7   :  { %v1111_v4 = vpop.f32.mrf.mxu1 }
 0x1e9   :  { %v822_v5 = vpop.f32.mrf.mxu1 }
 0x1ea   :  { %v578_v51 = vadd.f32 %v822_v5, %v422_v59 }
 0x1eb   :  { %v1113_v6 = vpop.f32.mrf.mxu1 }
 0x1ec   :  { %v632_v1 = vmax.f32 %v578_v51, 0.0 }
 0x1ed   :  { %v825_v7 = vpop.f32.mrf.mxu1 }
 0x1ee   :  { %v591_v50 = vadd.f32 %v825_v7, %v437_v39  ;;  %v570_v7 = vadd.f32 %v1113_v6, %v412_v0  ;;  %v645_v6 = vld [vmem:[%s1137_s5] sm:$0x1] }
 0x1ef   :  { %v582_v9 = vpop.f32.mrf.mxu1 }
 0x1f0   :  { %v635_v53 = vmax.f32 %v591_v50, 0.0  ;;  %v583_v60 = vadd.f32 %v582_v9, %v427_v49  ;;  %v631_v9 = vmax.f32 %v575_v62, 0.0 }
 0x1f1   :  { %v826_v11 = vpop.f32.mrf.mxu1 }
 0x1f2   :  { %v594_v46 = vadd.f32 %v826_v11, %v442_v36  ;;  %v633_v63 = vmax.f32 %v583_v60, 0.0  ;;  %v647_v5 = vpack.c.bf16 %v632_v1, %v631_v9 }
 0x1f3   :  { %v585_v12 = vpop.f32.mrf.mxu1 }
 0x1f4   :  { %v636_v56 = vmax.f32 %v594_v46, 0.0  ;;  %v586_v57 = vadd.f32 %v585_v12, %v432_v45  ;;  %v630_v12 = vmax.f32 %v570_v7, 0.0 }
 0x1f5   :  { %v829_v14 = vpop.f32.mrf.mxu1 }
 0x1f6   :  { %v607_v37 = vadd.f32 %v829_v14, %v457_v20  ;;  %v649_v54 = vpack.c.bf16 %v636_v56, %v635_v53  ;;  %v634_v52 = vmax.f32 %v586_v57, 0.0 }
 0x1f7   :  { %v598_v16 = vpop.f32.mrf.mxu1 }
 0x1f8   :  { %v639_v43 = vmax.f32 %v607_v37, 0.0  ;;  %v599_v44 = vadd.f32 %v598_v16, %v447_v27 }
 0x1f9   :  { %v830_v17 = vpop.f32.mrf.mxu1 }
 0x1fa   :  { %v610_v33 = vadd.f32 %v830_v17, %v462_v18  ;;  %v637_v55 = vmax.f32 %v599_v44, 0.0 }
 0x1fb   :  { %v601_v19 = vpop.f32.mrf.mxu1 }
 0x1fc   :  { %v640_v40 = vmax.f32 %v610_v33, 0.0  ;;  %v602_v41 = vadd.f32 %v601_v19, %v452_v24 }
 0x1fd   :  { %v833_v21 = vpop.f32.mrf.mxu1 }
 0x1fe   :  { %v623_v23 = vadd.f32 %v833_v21, %v477_v10  ;;  %v651_v47 = vpack.c.bf16 %v640_v40, %v639_v43  ;;  %v638_v48 = vmax.f32 %v602_v41, 0.0  ;;  %v407_v10 = vpop.permute.xlu0 %406 }
 0x1ff   :  { %v614_v22 = vpop.f32.mrf.mxu1  ;;  %v567_v11 = vadd.f32 %v1111_v4, %v407_v10 }
 0x200   :  { %v643_v29 = vmax.f32 %v623_v23, 0.0  ;;  %v615_v30 = vadd.f32 %v614_v22, %v467_v15  ;;  %v650_v58 = vpack.c.bf16 %v638_v48, %v637_v55 }
 0x201   :  { %v834_v25 = vpop.f32.mrf.mxu1 }
 0x202   :  { %v626_v26 = vadd.f32 %v834_v25, %v482_v8  ;;  %v641_v38 = vmax.f32 %v615_v30, 0.0  ;;  %v648_v8 = vpack.c.bf16 %v634_v52, %v633_v63  ;;  %v658_v14 = vpop.permute.xlu0 %657 }
 0x203   :  { %v617_v28 = vpop.f32.mrf.mxu1 }
 0x204   :  { %v644_v31 = vmax.f32 %v626_v26, 0.0  ;;  %v618_v32 = vadd.f32 %v617_v28, %v472_v13  ;;  %v629_v13 = vmax.f32 %v567_v11, 0.0 }
 0x206   :  { %v653_v34 = vpack.c.bf16 %v644_v31, %v643_v29  ;;  %v642_v35 = vmax.f32 %v618_v32, 0.0  ;;  %v646_v3 = vpack.c.bf16 %v630_v12, %v629_v13 }
 0x208   :  { %836 = vmatpush3.bf16.msra.mxu0 %v653_v34  ;;  %v652_v42 = vpack.c.bf16 %v642_v35, %v641_v38 }
 0x209   :  { %837 = vmatprep.subr.bf16.mxu0 %v885_v2 }
 0x20c   :  { %838 = vmatpush3.bf16.msra.mxu0 %v652_v42 }
 0x20d   :  { %839 = vmatprep.subr.bf16.mxu0 %v885_v2 }
 0x210   :  { %840 = vmatpush3.bf16.msra.mxu0 %v651_v47 }
 0x211   :  { %841 = vmatprep.subr.bf16.mxu0 %v885_v2 }
 0x214   :  { %842 = vmatpush3.bf16.msra.mxu0 %v650_v58 }
 0x215   :  { %843 = vmatprep.subr.bf16.mxu0 %v885_v2 }
 0x218   :  { %844 = vmatpush3.bf16.msra.mxu0 %v649_v54 }
 0x219   :  { %845 = vmatprep.subr.bf16.mxu0 %v885_v2 }
 0x21c   :  { %846 = vmatpush3.bf16.msra.mxu0 %v648_v8 }
 0x21d   :  { %847 = vmatprep.subr.bf16.mxu0 %v885_v2 }
 0x220   :  { %848 = vmatpush3.bf16.msra.mxu0 %v647_v5 }
 0x221   :  { %849 = vmatprep.subr.bf16.mxu0 %v885_v2 }
 0x224   :  { %850 = vmatpush3.bf16.msra.mxu0 %v646_v3 }
 0x227   :  { %852 = vmatmul.mubr.bf16.vlgmr.msra.gmra.mxu0 %v645_v6 }
 0x2e7   :  { %v694_v15 = vpop.f32.mrf.mxu0 }
 0x2e8   :  { %v695_v16 = vadd.f32 %v694_v15, %v658_v14 }
 0x2e9   :  { %v853_v4 = vpop.f32.mrf.mxu0 }
 0x2ea   :  { %v700_v17 = vmax.f32 %v695_v16, 0.0 }
 0x2eb   :  { %v697_v18 = vpop.f32.mrf.mxu0 }
 0x2ec   :  { %701 = vst [vmem:[%s1138_s7] sm:$0x3] %v700_v17 }
 0x2ed   :  { %v854_v19 = vpop.f32.mrf.mxu0 }

</bundles_post_ra>
